<compile_context>
chip_gen: v7x
topology: tpu7x:2x2x1
jax: 0.10.0
libtpu: 0.0.40
codegen_flags: <defaults>
</compile_context>

<pallas_src>
import jax
import jax.numpy as jnp
from jax.experimental import pallas as pl
from jax.experimental.pallas import tpu as pltpu


def _cdiv(a, b):
    return -(-a // b)


def _round_up(n, m):
    return _cdiv(n, m) * m


def _mlp_kernel(xa_ref, w1a_ref, w2a_ref, oT_ref):
    # Layer 1 (+bias via the ones row of xa) on the MXU: (H+1,5)@(5,TILE_B).
    h = jnp.dot(w1a_ref[...], xa_ref[...],
                preferred_element_type=jnp.float32,
                precision=jax.lax.Precision.HIGHEST)      # (H+1, TILE_B)
    # ReLU is the only VPU work; the passthrough row stays at relu(1)=1.
    h = jnp.maximum(h, 0.0)
    # Layer 2 (+bias via the constant-1 hidden row) on the MXU.
    y = jnp.dot(w2a_ref[...], h,
                preferred_element_type=jnp.float32,
                precision=jax.lax.Precision.HIGHEST)      # (2, TILE_B)
    oT_ref[...] = y.astype(oT_ref.dtype)


def _pallas_mlp_tb(xaT, w1a, w2a, *, tile_b):
    """Core kernel call. xaT: (5, Bpad) with a ones row appended (batch on
    lanes, Bpad % tile_b == 0). Returns (2, Bpad)."""
    f_in, b_pad = xaT.shape          # (5, Bpad)
    hp = w1a.shape[0]                # H + 1
    n_out = w2a.shape[0]             # 2
    assert b_pad % tile_b == 0

    flops = 2 * b_pad * (f_in * hp + hp * n_out)
    bytes_accessed = 4 * (b_pad * (f_in + n_out) + hp * f_in + n_out * hp)

    return pl.pallas_call(
        _mlp_kernel,
        out_shape=jax.ShapeDtypeStruct((n_out, b_pad), jnp.float32),
        grid_spec=pltpu.PrefetchScalarGridSpec(
            num_scalar_prefetch=0,
            grid=(b_pad // tile_b,),
            in_specs=[
                pl.BlockSpec((f_in, tile_b), lambda i: (0, i)),  # xa  (streamed)
                pl.BlockSpec((hp, f_in), lambda i: (0, 0)),      # w1a (resident)
                pl.BlockSpec((n_out, hp), lambda i: (0, 0)),     # w2a (resident)
            ],
            out_specs=pl.BlockSpec((n_out, tile_b), lambda i: (0, i)),
        ),
        compiler_params=pltpu.CompilerParams(
            dimension_semantics=("parallel",),   # batch tiles are independent
        ),
        cost_estimate=pl.CostEstimate(
            flops=flops, transcendentals=0, bytes_accessed=bytes_accessed),
    )(xaT, w1a, w2a)


def augment_params(w1, b1, w2, b2):
    """Fold biases into the weight matrices (done once, tiny arrays).

    w1: (H, 4), b1: (H, 1), w2: (2, H), b2: (2, 1)  (PyTorch layout)
    Returns w1a: (H+1, 5), w2a: (2, H+1)."""
    passthrough = jnp.array([[0.0, 0.0, 0.0, 0.0, 1.0]], dtype=w1.dtype)
    w1a = jnp.concatenate(
        [jnp.concatenate([w1, b1], axis=1), passthrough], axis=0)
    w2a = jnp.concatenate([w2, b2], axis=1)
    return w1a, w2a


def network_forward(x, w1, b1, w2, b2, *, tile_b=16384):
    """x: (B, 4) f32 (PyTorch layout). Returns squeeze((B, 2))."""
    B = x.shape[0]

    # ---- Tile sizing: big enough to amortize per-grid-step overhead, but
    # keep >=2 grid steps when possible (v7x megacore), minimal tail padding.
    b128 = _round_up(B, 128)
    tile = min(_round_up(int(tile_b), 128), b128)
    if b128 >= 256:
        tile = min(tile, _round_up(_cdiv(b128, 2), 128))
    n_blocks = _cdiv(b128, tile)
    tile = _round_up(_cdiv(b128, n_blocks), 128)   # rebalance -> least padding
    b_pad = n_blocks * tile

    # ---- Layout plumbing (the only wrapper-side copies). Callers already in
    # (features, batch) layout should build xaT themselves and call
    # _pallas_mlp_tb directly to avoid this traffic.
    w1a, w2a = augment_params(w1, b1, w2, b2)
    xaT = jnp.concatenate([x.T, jnp.ones((1, B), x.dtype)], axis=0)  # (5, B)
    xaT = jnp.pad(xaT, ((0, 0), (0, b_pad - B)))                     # (5, Bpad)

    outT = _pallas_mlp_tb(xaT, w1a, w2a, tile_b=tile)                # (2, Bpad)
    y = outT[:, :B].T                                                # (B, 2)
    # PyTorch: x.squeeze() -- removes all size-1 dims (B == 1 -> shape (2,)).
    return jnp.squeeze(y)


def init_params(hidden_nodes, key):
    """Deterministic init mimicking nn.Linear defaults (uniform +-1/sqrt(fan_in)).
    Weights in PyTorch (out, in) layout; biases as columns."""
    k1, k2, k3, k4 = jax.random.split(key, 4)
    bound1 = 1.0 / jnp.sqrt(4.0)
    bound2 = 1.0 / jnp.sqrt(float(hidden_nodes))
    w1 = jax.random.uniform(k1, (hidden_nodes, 4), jnp.float32, -bound1, bound1)
    b1 = jax.random.uniform(k2, (hidden_nodes, 1), jnp.float32, -bound1, bound1)
    w2 = jax.random.uniform(k3, (2, hidden_nodes), jnp.float32, -bound2, bound2)
    b2 = jax.random.uniform(k4, (2, 1), jnp.float32, -bound2, bound2)
    return w1, b1, w2, b2


def _reference(x, w1, b1, w2, b2):
    h = jnp.maximum(x @ w1.T + b1[:, 0], 0.0)
    return jnp.squeeze(h @ w2.T + b2[:, 0])


if __name__ == "__main__":
    hidden_nodes = 32

    key = jax.random.PRNGKey(0)
    kx, kp, kx1, kx2 = jax.random.split(key, 4)
    w1, b1, w2, b2 = init_params(hidden_nodes, kp)

    # Small, module-consistent shape: (batch=2, in_features=4).
    x_small = jax.random.normal(kx, (2, 4), jnp.float32)
    y_small = network_forward(x_small, w1, b1, w2, b2)
    jax.block_until_ready(y_small)
    ref_small = _reference(x_small, w1, b1, w2, b2)
    assert y_small.shape == ref_small.shape
    assert jnp.allclose(y_small, ref_small, atol=1e-5, rtol=1e-5)

    # B == 1: checks the squeeze() semantics (output shape (2,)).
    x_one = jax.random.normal(kx1, (1, 4), jnp.float32)
    y_one = network_forward(x_one, w1, b1, w2, b2)
    jax.block_until_ready(y_one)
    ref_one = _reference(x_one, w1, b1, w2, b2)
    assert y_one.shape == ref_one.shape == (2,)
    assert jnp.allclose(y_one, ref_one, atol=1e-5, rtol=1e-5)

    # Larger batch: exercises multi-step grid (>=2 blocks) + tail padding.
    x_big = jax.random.normal(kx2, (1000, 4), jnp.float32)
    y_big = network_forward(x_big, w1, b1, w2, b2)
    jax.block_until_ready(y_big)
    ref_big = _reference(x_big, w1, b1, w2, b2)
    assert y_big.shape == ref_big.shape
    assert jnp.allclose(y_big, ref_big, atol=1e-5, rtol=1e-5)

    print("KERNEL_OK")
</pallas_src>

<mosaic_0001>
module attributes {stable_mosaic.version = 11 : i64} {
  func.func @_mlp_kernel(%arg0: i32, %arg1: memref<5x128xf32, #tpu.memory_space<vmem>>, %arg2: memref<33x5xf32, #tpu.memory_space<vmem>>, %arg3: memref<2x33xf32, #tpu.memory_space<vmem>>, %arg4: memref<2x128xf32, #tpu.memory_space<vmem>>) attributes {dimension_semantics = [#tpu.dimension_semantics<parallel>], iteration_bounds = array<i64: 1>, scalar_prefetch = 0 : i64, scratch_operands = 0 : i64, tpu.core_type = #tpu.core_type<tc>, window_params = [{transform_indices = @transform_0, window_bounds = array<i64: 5, 128>}, {pipeline_mode = #tpu.pipeline_mode<synchronous>, transform_indices = @transform_1, window_bounds = array<i64: 33, 5>}, {pipeline_mode = #tpu.pipeline_mode<synchronous>, transform_indices = @transform_2, window_bounds = array<i64: 2, 33>}, {transform_indices = @transform_3, window_bounds = array<i64: 2, 128>}]} {
    %c0 = arith.constant 0 : index
    %c0_0 = arith.constant 0 : index
    %0 = vector.load %arg2[%c0, %c0_0] : memref<33x5xf32, #tpu.memory_space<vmem>>, vector<33x5xf32>
    %c0_1 = arith.constant 0 : index
    %c0_2 = arith.constant 0 : index
    %1 = vector.load %arg1[%c0_1, %c0_2] : memref<5x128xf32, #tpu.memory_space<vmem>>, vector<5x128xf32>
    %cst = arith.constant dense<0.000000e+00> : vector<33x128xf32>
    %2 = tpu.matmul %0, %1, %cst {dimension_numbers = #tpu.dot_dimension_numbers<[1], [0], [0], [1], [0, 0, 1, 1], [], []>, precision = #tpu.contract_precision<fp32>} : vector<33x5xf32>, vector<5x128xf32>, vector<33x128xf32> -> vector<33x128xf32>
    %cst_3 = arith.constant 0.000000e+00 : f32
    %3 = vector.broadcast %cst_3 : f32 to vector<33x128xf32>
    %4 = arith.maximumf %2, %3 : vector<33x128xf32>
    %c0_4 = arith.constant 0 : index
    %c0_5 = arith.constant 0 : index
    %5 = vector.load %arg3[%c0_4, %c0_5] : memref<2x33xf32, #tpu.memory_space<vmem>>, vector<2x33xf32>
    %cst_6 = arith.constant dense<0.000000e+00> : vector<2x128xf32>
    %6 = tpu.matmul %5, %4, %cst_6 {dimension_numbers = #tpu.dot_dimension_numbers<[1], [0], [0], [1], [0, 0, 1, 1], [], []>, precision = #tpu.contract_precision<fp32>} : vector<2x33xf32>, vector<33x128xf32>, vector<2x128xf32> -> vector<2x128xf32>
    %c0_7 = arith.constant 0 : index
    %c0_8 = arith.constant 0 : index
    %7 = vector.load %arg4[%c0_7, %c0_8] : memref<2x128xf32, #tpu.memory_space<vmem>>, vector<2x128xf32>
    tpu.vector_store %arg4[%c0_7, %c0_8], %6 {strides = array<i32>} : memref<2x128xf32, #tpu.memory_space<vmem>>, vector<2x128xf32>,
    return
  }
  func.func @transform_0(%arg0: i32) -> (i32, i32) {
    %c0_i32 = arith.constant 0 : i32
    %c0_i32_0 = arith.constant 0 : i32
    return %c0_i32, %arg0 : i32, i32
  }
  func.func @transform_1(%arg0: i32) -> (i32, i32) {
    %c0_i32 = arith.constant 0 : i32
    %c0_i32_0 = arith.constant 0 : i32
    %c0_i32_1 = arith.constant 0 : i32
    return %c0_i32, %c0_i32_0 : i32, i32
  }
  func.func @transform_2(%arg0: i32) -> (i32, i32) {
    %c0_i32 = arith.constant 0 : i32
    %c0_i32_0 = arith.constant 0 : i32
    %c0_i32_1 = arith.constant 0 : i32
    return %c0_i32, %c0_i32_0 : i32, i32
  }
  func.func @transform_3(%arg0: i32) -> (i32, i32) {
    %c0_i32 = arith.constant 0 : i32
    %c0_i32_0 = arith.constant 0 : i32
    return %c0_i32, %arg0 : i32, i32
  }
}

</mosaic_0001>

<bundles_post_ra>
// kernel: tpu_custom_call.1
= control target key start
LH: loop header
LB: loop body
LE: loop exit
PB: predicated region body
PF: predicated region fallthrough
CT: control target
= control target key end

     0   :  { %vm37_vm0 = vcmask 1044480   ;;  %v1559_v2 = vmov 0.0   ;;  %vm1560_vm1 = vmmov 0   ;;  %vm21_vm2 = vcmask 39936   ;;  %s1794_s0 = inlined_call_operand.vmem [shape: f32[5,128], index: 0, kind: input, shape index: {}]   ;;  %s1795_s1 = inlined_call_operand.vmem [shape: f32[33,5], index: 1, kind: input, shape index: {}]   ;;  %s1796_s2 = inlined_call_operand.vmem [shape: f32[2,33], index: 2, kind: input, shape index: {}]   ;;  %s1797_s3 = inlined_call_operand.hbm [shape: f32[2,128], index: 3, kind: output, shape index: {}]  }
   0x1   :  { %v20_v0 = vld [vmem:[%s1794_s0] sm:$0x1f]  ;;  %1275 = vmatprep.subr.mxu0 %v1559_v2  ;;  %1277 = vmatprep.mubr.msk.f32.mxu0 %vm1560_vm1, %v1559_v2  ;;  %v16_v4 = vld [vmem:[%s1795_s1 + $0x8] sm:$0xff]  ;;  %v17_v5 = vld [vmem:[%s1795_s1 + $0x10] sm:$0xff] }
   0x2   :  { %v15_v1 = vld [vmem:[%s1795_s1] sm:$0xff]  ;;  %v39_v3 = vsel %vm37_vm0, %v20_v0, 0  ;;  %v26_v8 = vsel %vm21_vm2, %v16_v4, 0  ;;  %1258 = vmatprep.subr.mxu1 %v1559_v2  ;;  %1260 = vmatprep.mubr.msk.f32.mxu1 %vm1560_vm1, %v1559_v2 }
   0x3   :  { %v1598_v6 = vand.u32 4294901760, %v39_v3  ;;  %v23_v7 = vsel %vm21_vm2, %v15_v1, 0 }
   0x4   :  { %v1605_v9 = vand.u32 4294901760, %v23_v7 }
   0x5   :  { %8 = vsyncpa [#allocation3], 0  ;;  %v1608_v10 = vsub.f32 %v39_v3, %v1598_v6  ;;  %v29_v11 = vsel %vm21_vm2, %v17_v5, 0  ;;  %1259 = vmatpush3.msra.mxu1 %v1598_v6  ;;  %v1615_v13 = vand.u32 4294901760, %v26_v8  ;;  %v18_v14 = vld [vmem:[%s1795_s1 + $0x18] sm:$0xff]  ;;  %v1561_v43 = vmov 0.0|0.0  }
   0x6   :  { %v1613_v12 = vsub.f32 %v23_v7, %v1605_v9  ;;  %1474 = vmatprep.subr.mxu1 %v1559_v2  ;;  %v1625_v17 = vand.u32 4294901760, %v29_v11  ;;  %v32_v20 = vsel %vm21_vm2, %v18_v14, 0  ;;  %v19_v21 = vld [vmem:[%s1795_s1 + $0x20] sm:$0x1]  ;;  %vm665_vm3 = vcmask 269312  }
   0x7   :  { %v160_v15 = vand.u32 4294901760, %v1608_v10  ;;  %v1623_v16 = vsub.f32 %v26_v8, %v1615_v13  ;;  %v1638_v26 = vand.u32 4294901760, %v32_v20  ;;  %v35_v29 = vsel %vm21_vm2, %v19_v21, 0  ;;  %v664_v55 = vld [vmem:[%s1796_s2] sm:$0x3]  ;;  %s1562_s2 = smov [#allocation2]  }
   0x8   :  { %v109_v18 = vand.u32 4294901760, %v1613_v12  ;;  %v128_v25 = vsub.f32 %v29_v11, %v1625_v17  ;;  %v1649_v32 = vand.u32 4294901760, %v35_v29  ;;  %v667_v59 = vsel %vm665_vm3, %v664_v55, 0  ;;  %s1178_s24 = sshll.u32 %s1562_s2, 4  ;;  %s1179_s24 = int_to_ptr.vmem [resolvable:$true] %s1178_s24 }
   0x9   :  { %v161_v19 = vsub.f32 %v1608_v10, %v160_v15  ;;  %v119_v22 = vand.u32 4294901760, %v1623_v16  ;;  %v138_v31 = vsub.f32 %v32_v20, %v1638_v26  ;;  %v1734_v0 = vand.u32 4294901760, %v667_v59  ;;  %s1535_s25 = scalar_lea.vmem %s1179_s24, 32  ;;  %p1540_p1 = scmp.lt.s32.totalorder %s1179_s24, %s1179_s24 }
   0xa   :  { %v110_v23 = vsub.f32 %v1613_v12, %v109_v18  ;;  %v129_v30 = vand.u32 4294901760, %v128_v25  ;;  %v148_v36 = vsub.f32 %v35_v29, %v1649_v32  ;;  %vm669_vm4 = vcmask 1040384   ;;  %p1536_p0 = scmp.ne.s32.totalorder %s1179_s24, %s1535_s25  ;;  %p1541_p2 = scmp.lt.s32.totalorder %s1535_s25, %s1535_s25 }
   0xb   :  { %v162_v24 = vand.u32 4294901760, %v161_v19  ;;  %v120_v28 = vsub.f32 %v1623_v16, %v119_v22  ;;  %v139_v35 = vand.u32 4294901760, %v138_v31 }
   0xc   :  { %v111_v27 = vand.u32 4294901760, %v110_v23  ;;  %v130_v34 = vsub.f32 %v128_v25, %v129_v30  ;;  %v149_v39 = vand.u32 4294901760, %v148_v36  ;;  %p1542_p3 = por %p1541_p2, %p1540_p1 }
   0xd   :  { %1276 = vmatpush3.msra.mxu0 %v162_v24  ;;  %v121_v33 = vand.u32 4294901760, %v120_v28  ;;  %v140_v38 = vsub.f32 %v138_v31, %v139_v35 }
   0xe   :  { %1278 = vmatmul.mubr.f32.vlgmr.msra.gmra.mrb[0].mxu0 %v1605_v9  ;;  %1292 = vmatprep.subr.mxu0 %v1559_v2  ;;  %v131_v37 = vand.u32 4294901760, %v130_v34  ;;  %v150_v41 = vsub.f32 %v148_v36, %v149_v39  ;;  %p1543_p4 = pnand %p1542_p3, %p1536_p0 }
   0xf   :  { %1293 = vmatpush3.msra.mxu0 %v1608_v10  ;;  %1280 = vmatprep.mubr.msk.f32.mxu0 %vm1560_vm1, %v1559_v2  ;;  %v141_v40 = vand.u32 4294901760, %v140_v38 }
  0x10   :  { %1309 = vmatprep.subr.mxu0 %v1559_v2  ;;  %1261 = vmatmul.mubr.f32.vlgmr.msra.gmra.mrb[0].mxu1 %v111_v27  ;;  %v151_v42 = vand.u32 4294901760, %v150_v41 }
  0x11   :  { %1263 = vmatprep.mubr.msk.f32.mxu1 %vm1560_vm1, %v1559_v2  ;;  %1475 = vmatpush3.msra.mxu1 %v162_v24 }
  0x12   :  { %1281 = vmatmul.mubr.f32.gmra.mrb[2].mxu0 %v1615_v13  ;;  %1438 = vmatprep.subr.bf16.mxu1 %v1561_v43 }
  0x13   :  { %1294 = vmatprep.mubr.msk.f32.mxu0 %vm1560_vm1, %v1559_v2 }
  0x14   :  { %1264 = vmatmul.mubr.f32.gmra.mrb[2].mxu1 %v121_v33 }
  0x15   :  { %1266 = vmatprep.mubr.msk.f32.mxu1 %vm1560_vm1, %v1559_v2 }
  0x16   :  { %1295 = vmatmul.mubr.f32.vlgmr.msra.gmra.mrb[0].mxu0 %v1613_v12 }
  0x17   :  { %1310 = vmatpush3.msra.mxu0 %v1598_v6  ;;  %1297 = vmatprep.mubr.msk.f32.mxu0 %vm1560_vm1, %v1559_v2 }
  0x18   :  { %1326 = vmatprep.subr.mxu0 %v1559_v2  ;;  %1267 = vmatmul.mubr.f32.gmra.mrb[4].mxu1 %v131_v37 }
  0x19   :  { %1269 = vmatprep.mubr.msk.f32.mxu1 %vm1560_vm1, %v1559_v2 }
  0x1a   :  { %1298 = vmatmul.mubr.f32.gmra.mrb[2].mxu0 %v1623_v16 }
  0x1b   :  { %1300 = vmatprep.mubr.msk.f32.mxu0 %vm1560_vm1, %v1559_v2 }
  0x1c   :  { %1270 = vmatmul.mubr.f32.gmra.mrb[6].mxu1 %v141_v40 }
  0x1d   :  { %1272 = vmatprep.mubr.msk.f32.mxu1 %vm1560_vm1, %v1559_v2 }
  0x1e   :  { %1301 = vmatmul.mubr.f32.gmra.mrb[4].mxu0 %v128_v25 }
  0x1f   :  { %1303 = vmatprep.mubr.msk.f32.mxu0 %vm1560_vm1, %v1559_v2 }
  0x20   :  { %1273 = vmatmul.mubr.f32.gmra.mrb[8].mxu1 %v151_v42 }
  0x21   :  { %1283 = vmatprep.mubr.msk.f32.mxu1 %vm1560_vm1, %v1559_v2 }
  0x22   :  { %1304 = vmatmul.mubr.f32.gmra.mrb[6].mxu0 %v138_v31 }
  0x23   :  { %1306 = vmatprep.mubr.msk.f32.mxu0 %vm1560_vm1, %v1559_v2 }
  0x24   :  { %1284 = vmatmul.mubr.f32.vlgmr.msra.gmra.mrb[4].mxu1 %v1625_v17 }
  0x25   :  { %1286 = vmatprep.mubr.msk.f32.mxu1 %vm1560_vm1, %v1559_v2 }
  0x26   :  { %1307 = vmatmul.mubr.f32.gmra.mrb[8].mxu0 %v148_v36 }
  0x27   :  { %1311 = vmatprep.mubr.msk.f32.mxu0 %vm1560_vm1, %v1559_v2 }
  0x28   :  { %1287 = vmatmul.mubr.f32.gmra.mrb[6].mxu1 %v1638_v26 }
  0x29   :  { %1289 = vmatprep.mubr.msk.f32.mxu1 %vm1560_vm1, %v1559_v2 }
  0x2a   :  { %1312 = vmatmul.mubr.f32.vlgmr.msra.gmra.mrb[0].mxu0 %v109_v18 }
  0x2b   :  { %1327 = vmatpush3.msra.mxu0 %v160_v15  ;;  %1314 = vmatprep.mubr.msk.f32.mxu0 %vm1560_vm1, %v1559_v2 }
  0x2c   :  { %1343 = vmatprep.subr.mxu0 %v1559_v2  ;;  %1290 = vmatmul.mubr.f32.gmra.mrb[8].mxu1 %v1649_v32 }
  0x2d   :  { %1370 = vmatprep.mubr.msk.f32.mxu1 %vm1560_vm1, %v1559_v2 }
  0x2e   :  { %1315 = vmatmul.mubr.f32.gmra.mrb[2].mxu0 %v119_v22 }
  0x2f   :  { %1317 = vmatprep.mubr.msk.f32.mxu0 %vm1560_vm1, %v1559_v2 }
  0x32   :  { %1318 = vmatmul.mubr.f32.gmra.mrb[4].mxu0 %v129_v30 }
  0x33   :  { %1320 = vmatprep.mubr.msk.f32.mxu0 %vm1560_vm1, %v1559_v2 }
  0x36   :  { %1321 = vmatmul.mubr.f32.gmra.mrb[6].mxu0 %v139_v35 }
  0x37   :  { %1323 = vmatprep.mubr.msk.f32.mxu0 %vm1560_vm1, %v1559_v2 }
  0x3a   :  { %1324 = vmatmul.mubr.f32.gmra.mrb[8].mxu0 %v149_v39 }
  0x3b   :  { %1328 = vmatprep.mubr.msk.f32.mxu0 %vm1560_vm1, %v1559_v2 }
  0x3e   :  { %1329 = vmatmul.mubr.f32.vlgmr.msra.gmra.mrb[0].mxu0 %v1605_v9 }
  0x3f   :  { %1344 = vmatpush3.msra.mxu0 %v1598_v6  ;;  %1331 = vmatprep.mubr.msk.f32.mxu0 %vm1560_vm1, %v1559_v2 }
  0x42   :  { %1332 = vmatmul.mubr.f32.gmra.mrb[2].mxu0 %v1615_v13 }
  0x43   :  { %1334 = vmatprep.mubr.msk.f32.mxu0 %vm1560_vm1, %v1559_v2 }
  0x46   :  { %1335 = vmatmul.mubr.f32.gmra.mrb[4].mxu0 %v1625_v17 }
  0x47   :  { %1337 = vmatprep.mubr.msk.f32.mxu0 %vm1560_vm1, %v1559_v2 }
  0x4a   :  { %1338 = vmatmul.mubr.f32.gmra.mrb[6].mxu0 %v1638_v26 }
  0x4b   :  { %1340 = vmatprep.mubr.msk.f32.mxu0 %vm1560_vm1, %v1559_v2 }
  0x4e   :  { %1341 = vmatmul.mubr.f32.gmra.mrb[8].mxu0 %v1649_v32 }
  0x4f   :  { %1345 = vmatprep.mubr.msk.f32.mxu0 %vm1560_vm1, %v1559_v2 }
  0x52   :  { %1346 = vmatmul.mubr.f32.vlgmr.msra.gmra.mrb[0].mxu0 %v1605_v9  ;;  %v1740_v9 = vsub.f32 %v667_v59, %v1734_v0 }
  0x53   :  { %1348 = vmatprep.mubr.msk.f32.mxu0 %vm1560_vm1, %v1559_v2 }
  0x54   :  { %v745_v19 = vand.u32 4294901760, %v1740_v9 }
  0x56   :  { %1349 = vmatmul.mubr.f32.gmra.mrb[2].mxu0 %v1615_v13 }
  0x57   :  { %1351 = vmatprep.mubr.msk.f32.mxu0 %vm1560_vm1, %v1559_v2 }
  0x5a   :  { %1352 = vmatmul.mubr.f32.gmra.mrb[4].mxu0 %v1625_v17 }
  0x5b   :  { %1354 = vmatprep.mubr.msk.f32.mxu0 %vm1560_vm1, %v1559_v2 }
  0x5e   :  { %1355 = vmatmul.mubr.f32.gmra.mrb[6].mxu0 %v1638_v26 }
  0x5f   :  { %1357 = vmatprep.mubr.msk.f32.mxu0 %vm1560_vm1, %v1559_v2 }
  0x62   :  { %1358 = vmatmul.mubr.f32.gmra.mrb[8].mxu0 %v1649_v32  ;;  %v746_v32 = vsub.f32 %v1740_v9, %v745_v19 }
  0x64   :  { %v747_v42 = vand.u32 4294901760, %v746_v32 }
  0xe3   :  { %v113_v44 = vpop.f32.mrb[0].mxu1 }
  0xe4   :  { %v1262_v45 = vpop.f32.mrb[1].mxu1 }
  0xe7   :  { %v123_v46 = vpop.f32.mrb[2].mxu1 }
  0xe8   :  { %v1265_v47 = vpop.f32.mrb[3].mxu1 }
  0xf7   :  { %v241_v48 = vpop.f32.mrb[4].mxu1 }
  0xf8   :  { %v1285_v49 = vpop.f32.mrb[5].mxu1 }
  0xfb   :  { %v247_v50 = vpop.f32.mrb[6].mxu1 }
  0xfc   :  { %v1288_v51 = vpop.f32.mrb[7].mxu1 }
  0xff   :  { %v253_v52 = vpop.f32.mrb[8].mxu1 }
 0x100   :  { %v1291_v53 = vpop.f32.mrb[9].mxu1 }
 0x125   :  { %v631_v54 = vpop.f32.mrb[0].mxu0 }
 0x126   :  { %v1476_v56 = vadd.f32 %v631_v54, %v113_v44  ;;  %v1347_v57 = vpop.f32.mrb[1].mxu0 }
 0x128   :  { %v659_v58 = vmax.f32 %v1476_v56, 0.0 }
 0x129   :  { %v637_v60 = vpop.f32.mrb[2].mxu0 }
 0x12a   :  { %v674_v61 = vand.u32 4294901760, %v659_v58  ;;  %v1477_v62 = vadd.f32 %v637_v60, %v123_v46  ;;  %v1350_v63 = vpop.f32.mrb[3].mxu0 }
 0x12c   :  { %v1736_v1 = vsub.f32 %v659_v58, %v674_v61  ;;  %v660_v3 = vmax.f32 %v1477_v62, 0.0 }
 0x12d   :  { %v643_v4 = vpop.f32.mrb[4].mxu0 }
 0x12e   :  { %v677_v5 = vand.u32 4294901760, %v660_v3  ;;  %v1478_v6 = vadd.f32 %v643_v4, %v241_v48  ;;  %v1353_v7 = vpop.f32.mrb[5].mxu0  ;;  %v756_v8 = vand.u32 4294901760, %v1736_v1 }
 0x130   :  { %v1742_v10 = vpack.c.bf16 %v677_v5, %v674_v61  ;;  %v762_v11 = vsub.f32 %v660_v3, %v677_v5  ;;  %v661_v12 = vmax.f32 %v1478_v6, 0.0  ;;  %v757_v18 = vsub.f32 %v1736_v1, %v756_v8 }
 0x131   :  { %v649_v13 = vpop.f32.mrb[6].mxu0 }
 0x132   :  { %v763_v14 = vand.u32 4294901760, %v762_v11  ;;  %v680_v15 = vand.u32 4294901760, %v661_v12  ;;  %v1479_v16 = vadd.f32 %v649_v13, %v247_v50  ;;  %v1356_v17 = vpop.f32.mrb[7].mxu0  ;;  %1440 = vmatpush3.bf16.msra.mxu1 %v1742_v10  ;;  %v1451_v20 = vpack.c.bf16 %v762_v11, %v1736_v1 }
 0x133   :  { %1441 = vmatprep.subr.bf16.mxu1 %v1561_v43  ;;  %v758_v31 = vand.u32 4294901760, %v757_v18 }
 0x134   :  { %v764_v21 = vsub.f32 %v762_v11, %v763_v14  ;;  %v769_v22 = vsub.f32 %v661_v12, %v680_v15  ;;  %v662_v23 = vmax.f32 %v1479_v16, 0.0  ;;  %v1463_v24 = vpack.c.bf16 %v763_v14, %v756_v8 }
 0x135   :  { %v655_v25 = vpop.f32.mrb[8].mxu0 }
 0x136   :  { %v765_v26 = vand.u32 4294901760, %v764_v21  ;;  %v770_v27 = vand.u32 4294901760, %v769_v22  ;;  %v683_v28 = vand.u32 4294901760, %v662_v23  ;;  %v1480_v29 = vadd.f32 %v655_v25, %v253_v52  ;;  %v1359_v30 = vpop.f32.mrb[9].mxu0 }
 0x138   :  { %v1442_v33 = vpack.c.bf16 %v683_v28, %v680_v15  ;;  %v776_v34 = vsub.f32 %v662_v23, %v683_v28  ;;  %v663_v35 = vmax.f32 %v1480_v29, 0.0  ;;  %v1445_v36 = vpack.c.bf16 %v765_v26, %v758_v31 }
 0x139   :  { %v771_v37 = vsub.f32 %v769_v22, %v770_v27 }
 0x13a   :  { %v777_v38 = vand.u32 4294901760, %v776_v34  ;;  %v671_v39 = vsel %vm669_vm4, %v663_v35, 0  ;;  %1443 = vmatpush3.bf16.msra.mxu1 %v1442_v33  ;;  %v1454_v40 = vpack.c.bf16 %v776_v34, %v769_v22 }
 0x13b   :  { %v686_v41 = vand.u32 4294901760, %v671_v39  ;;  %1368 = vmatprep.subr.mxu1 %v1559_v2  ;;  %v772_v47 = vand.u32 4294901760, %v771_v37 }
 0x13c   :  { %v778_v44 = vsub.f32 %v776_v34, %v777_v38  ;;  %v1466_v45 = vpack.c.bf16 %v777_v38, %v770_v27 }
 0x13d   :  { %v783_v46 = vsub.f32 %v671_v39, %v686_v41 }
 0x13e   :  { %v779_v48 = vand.u32 4294901760, %v778_v44  ;;  %1369 = vmatpush3.msra.mxu1 %v686_v41 }
 0x13f   :  { %v784_v49 = vand.u32 4294901760, %v783_v46  ;;  %1444 = vmatprep.subr.bf16.mxu1 %v1561_v43  ;;  %1371 = vmatmul.mubr.f32.vlgmr.msra.gmra.mrb[10].mxu1 %v747_v42 }
 0x140   :  { %1446 = vmatpush3.bf16.msra.mxu1 %v1445_v36  ;;  %v1448_v50 = vpack.c.bf16 %v779_v48, %v772_v47  ;;  %1383 = vmatprep.mubr.msk.f32.mxu1 %vm1560_vm1, %v1559_v2 }
 0x141   :  { %1447 = vmatprep.subr.bf16.mxu1 %v1561_v43  ;;  %v785_v51 = vsub.f32 %v783_v46, %v784_v49 }
 0x143   :  { %v786_v52 = vand.u32 4294901760, %v785_v51 }
 0x144   :  { %1449 = vmatpush3.bf16.msra.mxu1 %v1448_v50 }
 0x145   :  { %1381 = vmatprep.subr.mxu1 %v1559_v2 }
 0x148   :  { %1382 = vmatpush3.msra.mxu1 %v786_v52 }
 0x149   :  { %1450 = vmatprep.subr.bf16.mxu1 %v1561_v43  ;;  %1384 = vmatmul.mubr.f32.vlgmr.msra.gmra.mrb[10].mxu1 %v1734_v0 }
 0x14a   :  { %1452 = vmatpush3.bf16.msra.mxu1 %v1451_v20  ;;  %1396 = vmatprep.mubr.msk.f32.mxu1 %vm1560_vm1, %v1559_v2 }
 0x14b   :  { %1453 = vmatprep.subr.bf16.mxu1 %v1561_v43 }
 0x14e   :  { %1455 = vmatpush3.bf16.msra.mxu1 %v1454_v40 }
 0x14f   :  { %1394 = vmatprep.subr.mxu1 %v1559_v2 }
 0x152   :  { %1395 = vmatpush3.msra.mxu1 %v783_v46 }
 0x153   :  { %1456 = vmatprep.subr.bf16.mxu1 %v1561_v43  ;;  %1397 = vmatmul.mubr.f32.vlgmr.msra.gmra.mrb[10].mxu1 %v1740_v9 }
 0x154   :  { %1458 = vmatpush3.bf16.msra.mxu1 %v1742_v10  ;;  %1409 = vmatprep.mubr.msk.f32.mxu1 %vm1560_vm1, %v1559_v2 }
 0x155   :  { %1459 = vmatprep.subr.bf16.mxu1 %v1561_v43 }
 0x158   :  { %1461 = vmatpush3.bf16.msra.mxu1 %v1442_v33 }
 0x159   :  { %1407 = vmatprep.subr.mxu1 %v1559_v2 }
 0x15c   :  { %1408 = vmatpush3.msra.mxu1 %v686_v41 }
 0x15d   :  { %1462 = vmatprep.subr.bf16.mxu1 %v1561_v43  ;;  %1410 = vmatmul.mubr.f32.vlgmr.msra.gmra.mrb[10].mxu1 %v745_v19 }
 0x15e   :  { %1464 = vmatpush3.bf16.msra.mxu1 %v1463_v24  ;;  %1422 = vmatprep.mubr.msk.f32.mxu1 %vm1560_vm1, %v1559_v2 }
 0x15f   :  { %1465 = vmatprep.subr.bf16.mxu1 %v1561_v43 }
 0x162   :  { %1467 = vmatpush3.bf16.msra.mxu1 %v1466_v45 }
 0x163   :  { %1420 = vmatprep.subr.mxu1 %v1559_v2 }
 0x166   :  { %1421 = vmatpush3.msra.mxu1 %v784_v49 }
 0x167   :  { %1468 = vmatprep.subr.bf16.mxu1 %v1561_v43  ;;  %1423 = vmatmul.mubr.f32.vlgmr.msra.gmra.mrb[10].mxu1 %v1734_v0 }
 0x168   :  { %1470 = vmatpush3.bf16.msra.mxu1 %v1742_v10  ;;  %1435 = vmatprep.mubr.msk.f32.mxu1 %vm1560_vm1, %v1559_v2 }
 0x169   :  { %1471 = vmatprep.subr.bf16.mxu1 %v1561_v43 }
 0x16c   :  { %1473 = vmatpush3.bf16.msra.mxu1 %v1442_v33 }
 0x16d   :  { %1433 = vmatprep.subr.mxu1 %v1559_v2 }
 0x170   :  { %1434 = vmatpush3.msra.mxu1 %v686_v41 }
 0x171   :  { %1436 = vmatmul.mubr.f32.vlgmr.msra.gmra.mrb[10].mxu1 %v1734_v0 }
 0x244   :  { %v1167_v53 = vpop.f32.mrb[10].mxu1 }
 0x245   :  { %1171 = vst [vmem:[#allocation2] sm:$0x3] %v1167_v53  ;;  %v1437_v54 = vpop.f32.mrb[11].mxu1 }
 0x246   :  { %1546 = shalt.err (!%p1543_p4)
}
 0x247   :  { %s1547_s28 = scalar_lea.hbm %s1797_s3, 32 }
 0x248   :  { %p1548_p5 = scmp.ne.s32.totalorder %s1797_s3, %s1547_s28  ;;  %p1551_p6 = scmp.lt.u32.totalorder %s1547_s28, %s1797_s3 }
 0x24a   :  { %p1553_p7 = pnand %p1551_p6, %p1548_p5 }
 0x24c   :  { %1556 = shalt.err (!%p1553_p7)
}
 0x24d   :  { %1181 = dma.vmem_to_hbm [thread:$0]  %s1179_s24, 32, %s1797_s3, [#allocation3]  }
 0x24e   :  { %1557 = dma.done.wait [#allocation3], 32  }
 0x24f   :  { %1558 = vsyncadd [#allocation3], 4294967264 }
 0x250   :  { %1185 = vsyncpa [#allocation3], 1 }

</bundles_post_ra>
